<compile_context>
chip_gen: v6e
topology: v6e:2x2x1
jax: 0.10.0
libtpu: 0.0.40
codegen_flags: <defaults>
</compile_context>

<pallas_src>
import jax
import jax.numpy as jnp
from jax.experimental import pallas as pl
from jax.experimental.pallas import tpu as pltpu


_TARGET_BYTES_PER_STEP = 2 * 1024 * 1024  # ~2 MiB of input pixels per grid step


def _round_up(x, m):
    return (x + m - 1) // m * m


def _outconv_kernel(x_ref, w_ref, b_ref, o_ref):
    # x_ref: (Nb, Cin, TQ, 128) VMEM, pixels dense on sublanes+lanes.
    # w_ref: (Cout, Cin) SMEM,  b_ref: (Cout,) SMEM  -> scalar reads.
    # o_ref: (Nb, Cout, TQ, 128) VMEM.
    nb, cin = x_ref.shape[0], x_ref.shape[1]
    cout = o_ref.shape[1]
    for n in range(nb):
        # Load each input-channel plane once (f32 accumulate regardless of I/O dtype).
        xs = [x_ref[n, ci].astype(jnp.float32) for ci in range(cin)]
        for co in range(cout):
            acc = xs[0] * w_ref[co, 0]
            for ci in range(1, cin):
                acc = acc + xs[ci] * w_ref[co, ci]
            acc = acc + b_ref[co]
            o_ref[n, co] = jnp.maximum(acc, 0.0).astype(o_ref.dtype)


def _choose_tiles(N, Cin, hw_rows, itemsize):
    """Pick (nb, tq): batch images and 128-pixel sublane-rows per grid step."""
    target_rows = max(8, _TARGET_BYTES_PER_STEP // (Cin * 128 * itemsize))
    if hw_rows <= target_rows:
        # Whole pixel axis fits in one step; block batch images to keep
        # bytes/step high.
        tq = hw_rows
        nb = max(1, min(N, target_rows // max(hw_rows, 1)))
        # Keep >= 2 grid steps for v7x megacore when possible.
        if N > 1 and pl.cdiv(N, nb) < 2:
            nb = max(1, (N + 1) // 2)
    else:
        nb = 1
        tq = _round_up(target_rows, 8)
        if N == 1:
            # Single image: keep >= 2 pixel steps so both v7x TCs get work.
            tq = min(tq, max(8, _round_up(pl.cdiv(hw_rows, 2), 8)))
        if tq > hw_rows:
            tq = hw_rows  # equals full dim -> valid block shape
    return nb, tq


def outconv(x_nchw, w, b):
    """Conv2d(kernel_size=1) + ReLU on NCHW input (PyTorch Outconv.forward).

    x_nchw: (N, Cin, H, W); w: (Cout, Cin) or (Cout, Cin, 1, 1); b: (Cout,).
    Returns (N, Cout, H, W) in x's dtype.
    """
    if w.ndim == 4:  # PyTorch conv weight (Cout, Cin, 1, 1)
        w = w[:, :, 0, 0]
    N, Cin, H, W = x_nchw.shape
    Cout = w.shape[0]
    HW = H * W

    # Pixels packed onto (sublane, lane) = (HW/128, 128).  Free view when HW
    # is a multiple of 128; otherwise pad the pixel axis (extra copy, sliced
    # off below).
    hw_pad = _round_up(HW, 128)
    x3 = x_nchw.reshape(N, Cin, HW)
    if hw_pad != HW:
        x3 = jnp.pad(x3, ((0, 0), (0, 0), (0, hw_pad - HW)))
    hw_rows = hw_pad // 128
    x4 = x3.reshape(N, Cin, hw_rows, 128)

    itemsize = jnp.dtype(x_nchw.dtype).itemsize
    nb, tq = _choose_tiles(N, Cin, hw_rows, itemsize)
    grid = (pl.cdiv(N, nb), pl.cdiv(hw_rows, tq))

    w_f32 = w.astype(jnp.float32)
    b_f32 = b.astype(jnp.float32)

    y4 = pl.pallas_call(
        _outconv_kernel,
        out_shape=jax.ShapeDtypeStruct((N, Cout, hw_rows, 128), x_nchw.dtype),
        grid_spec=pltpu.PrefetchScalarGridSpec(
            num_scalar_prefetch=0,
            grid=grid,
            in_specs=[
                # Pixel planes: dense (tq, 128) tiles per (image, channel).
                pl.BlockSpec((nb, Cin, tq, 128), lambda i, p: (i, 0, p, 0)),
                # Tiny weight / bias tables live in SMEM, read as scalars.
                pl.BlockSpec(memory_space=pltpu.MemorySpace.SMEM),
                pl.BlockSpec(memory_space=pltpu.MemorySpace.SMEM),
            ],
            out_specs=pl.BlockSpec((nb, Cout, tq, 128), lambda i, p: (i, 0, p, 0)),
        ),
        compiler_params=pltpu.CompilerParams(
            dimension_semantics=("parallel", "parallel"),
            # Buffers are a few MiB double-buffered; explicit ceiling keeps
            # double buffering intact on every generation (incl. 64 MiB v7x).
            vmem_limit_bytes=32 * 1024 * 1024,
        ),
    )(x4, w_f32, b_f32)

    y3 = y4.reshape(N, Cout, hw_pad)
    if hw_pad != HW:
        y3 = y3[:, :, :HW]
    return y3.reshape(N, Cout, H, W)


def _reference(x_nchw, w, b):
    # Pure-JAX reference for the 1x1 conv + ReLU.
    if w.ndim == 4:
        w = w[:, :, 0, 0]
    y = jnp.einsum("nchw,oc->nohw", x_nchw, w) + b[None, :, None, None]
    return jnp.maximum(y, 0.0)


if __name__ == "__main__":
    key = jax.random.PRNGKey(0)
    k_x, k_w, k_b = jax.random.split(key, 3)

    N, Cin, H, W = 2, 4, 16, 16
    Cout = 3

    x = jax.random.normal(k_x, (N, Cin, H, W), dtype=jnp.float32)
    # Deterministic synthetic params (shapes match nn.Conv2d(Cin, Cout, 1)).
    w = jax.random.normal(k_w, (Cout, Cin), dtype=jnp.float32) * 0.5
    b = jax.random.normal(k_b, (Cout,), dtype=jnp.float32) * 0.1

    y = jax.block_until_ready(outconv(x, w, b))
    y_ref = _reference(x, w, b)
    assert y.shape == (N, Cout, H, W)
    assert jnp.allclose(y, y_ref, atol=1e-5, rtol=1e-5)

    # Tail case: H*W not a multiple of 128 exercises the padded-pixel path.
    H2, W2 = 10, 10
    x2 = jax.random.normal(k_x, (N, Cin, H2, W2), dtype=jnp.float32)
    y2 = jax.block_until_ready(outconv(x2, w, b))
    assert jnp.allclose(y2, _reference(x2, w, b), atol=1e-5, rtol=1e-5)

    print("KERNEL_OK")
</pallas_src>

<mosaic_0001>
module attributes {stable_mosaic.version = 11 : i64} {
  func.func @_outconv_kernel(%arg0: i32, %arg1: i32, %arg2: memref<1x4x2x128xf32, #tpu.memory_space<vmem>>, %arg3: memref<3x4xf32, #tpu.memory_space<smem>>, %arg4: memref<3xf32, #tpu.memory_space<smem>>, %arg5: memref<1x3x2x128xf32, #tpu.memory_space<vmem>>) attributes {dimension_semantics = [#tpu.dimension_semantics<parallel>, #tpu.dimension_semantics<parallel>], iteration_bounds = array<i64: 2, 1>, scalar_prefetch = 0 : i64, scratch_operands = 0 : i64, tpu.core_type = #tpu.core_type<tc>, window_params = [{transform_indices = @transform_0, window_bounds = array<i64: 1, 4, 2, 128>}, {transform_indices = @transform_1, window_bounds = array<i64: 3, 4>}, {transform_indices = @transform_2, window_bounds = array<i64: 3>}, {transform_indices = @transform_3, window_bounds = array<i64: 1, 3, 2, 128>}]} {
    %c0 = arith.constant 0 : index
    %c0_0 = arith.constant 0 : index
    %c0_1 = arith.constant 0 : index
    %c0_2 = arith.constant 0 : index
    %0 = vector.load %arg2[%c0, %c0_0, %c0_1, %c0_2] : memref<1x4x2x128xf32, #tpu.memory_space<vmem>>, vector<1x1x2x128xf32>
    %1 = vector.shape_cast %0 : vector<1x1x2x128xf32> to vector<2x128xf32>
    %c0_3 = arith.constant 0 : index
    %c1 = arith.constant 1 : index
    %c0_4 = arith.constant 0 : index
    %c0_5 = arith.constant 0 : index
    %2 = vector.load %arg2[%c0_3, %c1, %c0_4, %c0_5] : memref<1x4x2x128xf32, #tpu.memory_space<vmem>>, vector<1x1x2x128xf32>
    %3 = vector.shape_cast %2 : vector<1x1x2x128xf32> to vector<2x128xf32>
    %c0_6 = arith.constant 0 : index
    %c2 = arith.constant 2 : index
    %c0_7 = arith.constant 0 : index
    %c0_8 = arith.constant 0 : index
    %4 = vector.load %arg2[%c0_6, %c2, %c0_7, %c0_8] : memref<1x4x2x128xf32, #tpu.memory_space<vmem>>, vector<1x1x2x128xf32>
    %5 = vector.shape_cast %4 : vector<1x1x2x128xf32> to vector<2x128xf32>
    %c0_9 = arith.constant 0 : index
    %c3 = arith.constant 3 : index
    %c0_10 = arith.constant 0 : index
    %c0_11 = arith.constant 0 : index
    %6 = vector.load %arg2[%c0_9, %c3, %c0_10, %c0_11] : memref<1x4x2x128xf32, #tpu.memory_space<vmem>>, vector<1x1x2x128xf32>
    %7 = vector.shape_cast %6 : vector<1x1x2x128xf32> to vector<2x128xf32>
    %c0_12 = arith.constant 0 : index
    %c0_13 = arith.constant 0 : index
    %8 = memref.load %arg3[%c0_12, %c0_13] : memref<3x4xf32, #tpu.memory_space<smem>>
    %9 = vector.broadcast %8 : f32 to vector<2x128xf32>
    %10 = arith.mulf %1, %9 : vector<2x128xf32>
    %c0_14 = arith.constant 0 : index
    %c1_15 = arith.constant 1 : index
    %11 = memref.load %arg3[%c0_14, %c1_15] : memref<3x4xf32, #tpu.memory_space<smem>>
    %12 = vector.broadcast %11 : f32 to vector<2x128xf32>
    %13 = arith.mulf %3, %12 : vector<2x128xf32>
    %14 = arith.addf %10, %13 : vector<2x128xf32>
    %c0_16 = arith.constant 0 : index
    %c2_17 = arith.constant 2 : index
    %15 = memref.load %arg3[%c0_16, %c2_17] : memref<3x4xf32, #tpu.memory_space<smem>>
    %16 = vector.broadcast %15 : f32 to vector<2x128xf32>
    %17 = arith.mulf %5, %16 : vector<2x128xf32>
    %18 = arith.addf %14, %17 : vector<2x128xf32>
    %c0_18 = arith.constant 0 : index
    %c3_19 = arith.constant 3 : index
    %19 = memref.load %arg3[%c0_18, %c3_19] : memref<3x4xf32, #tpu.memory_space<smem>>
    %20 = vector.broadcast %19 : f32 to vector<2x128xf32>
    %21 = arith.mulf %7, %20 : vector<2x128xf32>
    %22 = arith.addf %18, %21 : vector<2x128xf32>
    %c0_20 = arith.constant 0 : index
    %23 = memref.load %arg4[%c0_20] : memref<3xf32, #tpu.memory_space<smem>>
    %24 = vector.broadcast %23 : f32 to vector<2x128xf32>
    %25 = arith.addf %22, %24 : vector<2x128xf32>
    %cst = arith.constant 0.000000e+00 : f32
    %26 = vector.broadcast %cst : f32 to vector<2x128xf32>
    %27 = arith.maximumf %25, %26 : vector<2x128xf32>
    %c0_21 = arith.constant 0 : index
    %c0_22 = arith.constant 0 : index
    %c0_23 = arith.constant 0 : index
    %c0_24 = arith.constant 0 : index
    %28 = vector.load %arg5[%c0_21, %c0_22, %c0_23, %c0_24] : memref<1x3x2x128xf32, #tpu.memory_space<vmem>>, vector<1x1x2x128xf32>
    %29 = vector.shape_cast %28 : vector<1x1x2x128xf32> to vector<2x128xf32>
    %30 = vector.shape_cast %27 : vector<2x128xf32> to vector<1x1x2x128xf32>
    tpu.vector_store %arg5[%c0_21, %c0_22, %c0_23, %c0_24], %30 {strides = array<i32>} : memref<1x3x2x128xf32, #tpu.memory_space<vmem>>, vector<1x1x2x128xf32>,
    %c1_25 = arith.constant 1 : index
    %c0_26 = arith.constant 0 : index
    %31 = memref.load %arg3[%c1_25, %c0_26] : memref<3x4xf32, #tpu.memory_space<smem>>
    %32 = vector.broadcast %31 : f32 to vector<2x128xf32>
    %33 = arith.mulf %1, %32 : vector<2x128xf32>
    %c1_27 = arith.constant 1 : index
    %c1_28 = arith.constant 1 : index
    %34 = memref.load %arg3[%c1_27, %c1_28] : memref<3x4xf32, #tpu.memory_space<smem>>
    %35 = vector.broadcast %34 : f32 to vector<2x128xf32>
    %36 = arith.mulf %3, %35 : vector<2x128xf32>
    %37 = arith.addf %33, %36 : vector<2x128xf32>
    %c1_29 = arith.constant 1 : index
    %c2_30 = arith.constant 2 : index
    %38 = memref.load %arg3[%c1_29, %c2_30] : memref<3x4xf32, #tpu.memory_space<smem>>
    %39 = vector.broadcast %38 : f32 to vector<2x128xf32>
    %40 = arith.mulf %5, %39 : vector<2x128xf32>
    %41 = arith.addf %37, %40 : vector<2x128xf32>
    %c1_31 = arith.constant 1 : index
    %c3_32 = arith.constant 3 : index
    %42 = memref.load %arg3[%c1_31, %c3_32] : memref<3x4xf32, #tpu.memory_space<smem>>
    %43 = vector.broadcast %42 : f32 to vector<2x128xf32>
    %44 = arith.mulf %7, %43 : vector<2x128xf32>
    %45 = arith.addf %41, %44 : vector<2x128xf32>
    %c1_33 = arith.constant 1 : index
    %46 = memref.load %arg4[%c1_33] : memref<3xf32, #tpu.memory_space<smem>>
    %47 = vector.broadcast %46 : f32 to vector<2x128xf32>
    %48 = arith.addf %45, %47 : vector<2x128xf32>
    %cst_34 = arith.constant 0.000000e+00 : f32
    %49 = vector.broadcast %cst_34 : f32 to vector<2x128xf32>
    %50 = arith.maximumf %48, %49 : vector<2x128xf32>
    %c0_35 = arith.constant 0 : index
    %c1_36 = arith.constant 1 : index
    %c0_37 = arith.constant 0 : index
    %c0_38 = arith.constant 0 : index
    %51 = vector.load %arg5[%c0_35, %c1_36, %c0_37, %c0_38] : memref<1x3x2x128xf32, #tpu.memory_space<vmem>>, vector<1x1x2x128xf32>
    %52 = vector.shape_cast %51 : vector<1x1x2x128xf32> to vector<2x128xf32>
    %53 = vector.shape_cast %50 : vector<2x128xf32> to vector<1x1x2x128xf32>
    tpu.vector_store %arg5[%c0_35, %c1_36, %c0_37, %c0_38], %53 {strides = array<i32>} : memref<1x3x2x128xf32, #tpu.memory_space<vmem>>, vector<1x1x2x128xf32>,
    %c2_39 = arith.constant 2 : index
    %c0_40 = arith.constant 0 : index
    %54 = memref.load %arg3[%c2_39, %c0_40] : memref<3x4xf32, #tpu.memory_space<smem>>
    %55 = vector.broadcast %54 : f32 to vector<2x128xf32>
    %56 = arith.mulf %1, %55 : vector<2x128xf32>
    %c2_41 = arith.constant 2 : index
    %c1_42 = arith.constant 1 : index
    %57 = memref.load %arg3[%c2_41, %c1_42] : memref<3x4xf32, #tpu.memory_space<smem>>
    %58 = vector.broadcast %57 : f32 to vector<2x128xf32>
    %59 = arith.mulf %3, %58 : vector<2x128xf32>
    %60 = arith.addf %56, %59 : vector<2x128xf32>
    %c2_43 = arith.constant 2 : index
    %c2_44 = arith.constant 2 : index
    %61 = memref.load %arg3[%c2_43, %c2_44] : memref<3x4xf32, #tpu.memory_space<smem>>
    %62 = vector.broadcast %61 : f32 to vector<2x128xf32>
    %63 = arith.mulf %5, %62 : vector<2x128xf32>
    %64 = arith.addf %60, %63 : vector<2x128xf32>
    %c2_45 = arith.constant 2 : index
    %c3_46 = arith.constant 3 : index
    %65 = memref.load %arg3[%c2_45, %c3_46] : memref<3x4xf32, #tpu.memory_space<smem>>
    %66 = vector.broadcast %65 : f32 to vector<2x128xf32>
    %67 = arith.mulf %7, %66 : vector<2x128xf32>
    %68 = arith.addf %64, %67 : vector<2x128xf32>
    %c2_47 = arith.constant 2 : index
    %69 = memref.load %arg4[%c2_47] : memref<3xf32, #tpu.memory_space<smem>>
    %70 = vector.broadcast %69 : f32 to vector<2x128xf32>
    %71 = arith.addf %68, %70 : vector<2x128xf32>
    %cst_48 = arith.constant 0.000000e+00 : f32
    %72 = vector.broadcast %cst_48 : f32 to vector<2x128xf32>
    %73 = arith.maximumf %71, %72 : vector<2x128xf32>
    %c0_49 = arith.constant 0 : index
    %c2_50 = arith.constant 2 : index
    %c0_51 = arith.constant 0 : index
    %c0_52 = arith.constant 0 : index
    %74 = vector.load %arg5[%c0_49, %c2_50, %c0_51, %c0_52] : memref<1x3x2x128xf32, #tpu.memory_space<vmem>>, vector<1x1x2x128xf32>
    %75 = vector.shape_cast %74 : vector<1x1x2x128xf32> to vector<2x128xf32>
    %76 = vector.shape_cast %73 : vector<2x128xf32> to vector<1x1x2x128xf32>
    tpu.vector_store %arg5[%c0_49, %c2_50, %c0_51, %c0_52], %76 {strides = array<i32>} : memref<1x3x2x128xf32, #tpu.memory_space<vmem>>, vector<1x1x2x128xf32>,
    return
  }
  func.func @transform_0(%arg0: i32, %arg1: i32) -> (i32, i32, i32, i32) {
    %c0_i32 = arith.constant 0 : i32
    %c0_i32_0 = arith.constant 0 : i32
    %c0_i32_1 = arith.constant 0 : i32
    return %arg0, %c0_i32, %arg1, %c0_i32_0 : i32, i32, i32, i32
  }
  func.func @transform_1(%arg0: i32, %arg1: i32) -> (i32, i32) {
    %c0_i32 = arith.constant 0 : i32
    %c0_i32_0 = arith.constant 0 : i32
    %c0_i32_1 = arith.constant 0 : i32
    return %c0_i32, %c0_i32_0 : i32, i32
  }
  func.func @transform_2(%arg0: i32, %arg1: i32) -> i32 {
    %c0_i32 = arith.constant 0 : i32
    %c0_i32_0 = arith.constant 0 : i32
    return %c0_i32 : i32
  }
  func.func @transform_3(%arg0: i32, %arg1: i32) -> (i32, i32, i32, i32) {
    %c0_i32 = arith.constant 0 : i32
    %c0_i32_0 = arith.constant 0 : i32
    %c0_i32_1 = arith.constant 0 : i32
    return %arg0, %c0_i32, %arg1, %c0_i32_0 : i32, i32, i32, i32
  }
}

</mosaic_0001>

<bundles_post_ra>
// kernel: tpu_custom_call.1
= control target key start
LH: loop header
LB: loop body
LE: loop exit
PB: predicated region body
PF: predicated region fallthrough
CT: control target
= control target key end

     0   :  { %s907_s0 = inlined_call_operand.hbm [shape: f32[2,4,2,128], index: 0, kind: input, shape index: {}]   ;;  %s908_s1 = inlined_call_operand.hbm [shape: f32[3,4], index: 1, kind: input, shape index: {}]   ;;  %s909_s2 = inlined_call_operand.vmem [shape: f32[3], index: 2, kind: input, shape index: {}]   ;;  %s910_s3 = inlined_call_operand.hbm [shape: f32[2,3,2,128], index: 3, kind: output, shape index: {}]  }
   0x1   :  { %912 = sst [smem:[#allocation14_spill]] %s908_s1 }
   0x2   :  { %8 = vsyncpa [#allocation3], 0 }
   0x3   :  { %10 = vsyncpa [#allocation3 + $0x1], 0 }
   0x4   :  { %11 = vsyncpa [#allocation5], 0 }
   0x5   :  { %12 = vsyncpa [#allocation6], 0 }
   0x6   :  { %13 = vsyncpa [#allocation4], 0 }
   0x7   :  { %15 = vsyncpa [#allocation4 + $0x1], 0  ;;  %s720_s12 = smov 0   ;;  %s722_s13 = smov 0  }
   0x8   :  { %s724_s14 = smov 0   ;;  %s726_s15 = smov 0  }
   0x9   :  { %s728_s16 = smov 0   ;;  %s730_s17 = smov 0  }
   0xa LB: > { %s424_s18 = sadd.s32 4294967295, %s690_s17   ;;  %s425_s19 = sadd.s32 4294967294, %s690_s17   ;;  %s690_s17 = sphi %s730_s17, %s21_s17   ;;  %s686_s16 = sphi %s728_s16, %s928_s16   ;;  %s682_s15 = sphi %s726_s15, %s927_s15   ;;  %s678_s14 = sphi %s724_s14, %s926_s14   ;;  %s674_s13 = sphi %s722_s13, %s925_s13   ;;  %s670_s12 = sphi %s720_s12, %s924_s12  }
   0xb   : > { %s42_s20 = sadd.s32 1, %s678_s14  ;;  %p49_p0 = scmp.ne.s32.totalorder %s678_s14, %s674_s13 }
   0xc   : > { %p50_p1 = scmp.eq.s32.totalorder %s690_s17, 0  ;;  %p55_p2 = scmp.ne.s32.totalorder %s674_s13, %s670_s12 }
   0xd   : > { %p758_p3 = scmp.eq.s32.totalorder %s424_s18, 0  ;;  %p123_p4 = scmp.eq.s32.totalorder %s424_s18, 1 }
   0xe   : > { %p51_p5 = por %p50_p1, %p49_p0  ;;  %p129_p6 = scmp.eq.s32.totalorder %s425_s19, 1 }
   0xf   : > { %p764_p7 = por %p758_p3, %p55_p2  ;;  %p768_p8 = por %p123_p4, %p49_p0 }
  0x10   : > { %p772_p9 = por %p129_p6, %p55_p2  ;;  %p426_p10 = scmp.ge.s32.totalorder %s690_s17, 1 }
  0x11   : > { %s915_s23 = scalar_select %p768_p8, 1, 0 }
  0x12   : > { %s916_s24 = scalar_select %p772_p9, 1, 0 }
  0x13   : > { %p136_p11 = scmp.lt.s32.totalorder %s690_s17, 3  ;;  %p490_p1 = scmp.lt.s32.totalorder %s690_s17, 2 }
  0x14   : > { %s158_s28 = sshll.u32 %s909_s2, 4  ;;  %s169_s4 = sand.u32 1, %s678_s14   ;;  %s159_s28 = int_to_ptr.vmem [resolvable:$true] %s158_s28 }
  0x15   : > { %p779_p13 = pnand %p426_p10, %p136_p11  ;;  %p789_p4 = pnand %p490_p1, %p51_p5 }
  0x16   : > { %s33_s5 = sadd.s32 1, %s686_s16  ;;  %s692_s6 = smov [#allocation7]  }
  0x17   : > { %p473_p0 = pneg %p779_p13  ;;  %s920_s1 = sld [smem:[#allocation14_spill]] }
  0x18   : > { %s559_s9 = scalar_lea.vmem %s159_s28, 16  ;;  %p567_p1 = scmp.lt.s32.totalorder %s159_s28, %s159_s28 }
  0x19   : > { %p795_p2 = pnand %p473_p0, %p758_p3  ;;  %p560_p5 = scmp.ne.s32.totalorder %s159_s28, %s559_s9 }
  0x1a   : > { %p568_p0 = scmp.lt.s32.totalorder %s559_s9, %s559_s9 }
  0x1b   : > { %p561_p6 = pneg %p795_p2 }
  0x1c   : > { %p569_p12 = por %p568_p0, %p567_p1 }
  0x1d   : > { %476 = dma.hbm_to_smem (!%p795_p2), %s920_s1, 64, %s692_s6, [#allocation5]  }
  0x1e   : > { %p562_p10 = pnand %p561_p6, %p560_p5 }
  0x20   : > { %p563_p11 = pneg %p562_p10 }
  0x22   : > { %p570_p9 = pnand %p569_p12, %p563_p11 }
  0x24   : > { %573 = shalt.err (!%p570_p9)
}
  0x25   : > { %s693_s10 = smov [#allocation8]   ;;  %p35_p8 = scmp.ge.s32.totalorder %s33_s5, 2 }
  0x26   : > { %479 = dma.vmem_to_smem (!%p795_p2), %s159_s28, 16, %s693_s10, [#allocation6]  }
  0x27   : > { %s430_s11 = sshll.u32 %s169_s4, 3  ;;  %s458_s18 = sshll.u32 %s686_s16, 7 }
  0x28   : > { %s930_s5 = smov (%p35_p8, %s33_s5), 0  ;;  %s180_s27 = scalar_lea.hbm %s907_s0, %s458_s18 }
  0x29   : > { %s37_s6 = ssub.s32 %s686_s16, %s930_s5  ;;  %s173_s7 = scalar_lea.vmem [#allocation2], %s430_s11 }
  0x2a   : > { %s181_s8 = sshll.u32 %s173_s7, 4  ;;  %p40_p9 = scmp.eq.s32.totalorder %s37_s6, 0  ;;  %s182_s8 = int_to_ptr.vmem [resolvable:$true] %s181_s8 }
  0x2b   : > { %s170_s9 = scalar_lea.sflag [#allocation3], %s169_s4  ;;  %p576_p12 = pneg %p789_p4 }
  0x2c   : > { %s821_s30 = scalar_select %p40_p9, %s678_s14, %s42_s20  }
  0x2d   : > { %s587_s28 = scalar_lea.vmem %s182_s8, 128  ;;  %s694_s10 = smov [#allocation2]  }
  0x2e   : > { %p588_p2 = scmp.ne.s32.totalorder %s182_s8, %s587_s28  ;;  %s592_s1 = sshll.u32 %s694_s10, 4  ;;  %s593_s1 = int_to_ptr.vmem [resolvable:$false] %s592_s1 }
  0x2f   : > { %s594_s19 = scalar_lea.vmem %s593_s1, 256  ;;  %p595_p6 = scmp.lt.s32.totalorder %s182_s8, %s593_s1 }
  0x30   : > { %p590_p8 = pnand %p588_p2, %p576_p12  ;;  %p596_p10 = scmp.lt.s32.totalorder %s594_s19, %s587_s28 }
  0x32   : > { %p591_p5 = pneg %p590_p8  ;;  %p597_p11 = por %p596_p10, %p595_p6 }
  0x34   : > { %p598_p1 = pnand %p597_p11, %p591_p5 }
  0x36   : > { %601 = shalt.err (!%p598_p1)
}
  0x37   : > { %s695_s11 = smov 32   ;;  %s696_s20 = smov 2  }
  0x38   : > { %483 = dma.hbm_to_vmem [thread:$0]  (!%p789_p4), %s180_s27, 128, %s182_s8, %s170_s9, %s695_s11, %s695_s11, %s696_s20  }
  0x39   : > { %193 = sbr.rel (%p779_p13) target bundleno = 113 (0x71), region = 32  ;;  %s830_s4 = sand.u32 (!%p779_p13), 1, %s674_s13  }
  0x3a   : > { %s434_s18 = sshll.u32 (!%p779_p13), %s830_s4, 3  ;;  %s196_s1 = scalar_lea.sflag (!%p779_p13), [#allocation3], %s830_s4 }
  0x3b   : > { %s199_s26 = scalar_lea.vmem (!%p779_p13), [#allocation2], %s434_s18 }
  0x3e   : > { %653 = dma.done.wait (%p764_p7), %s196_s1, 128  }
  0x3f   : > { %655 = vsyncadd (%p764_p7), %s196_s1, 4294967168 }
  0x40   : > { %657 = dma.done.wait (%p758_p3), [#allocation5], 64  }
  0x41   : > { %659 = vsyncadd (%p758_p3), [#allocation5], 4294967232 }
  0x42   : > { %661 = dma.done.wait (%p758_p3), [#allocation6], 16  }
  0x43   : > { %663 = vsyncadd (%p758_p3), [#allocation6], 4294967280 }
  0x44   : > { %212 = sfence }
  0x45   : > { %s238_s25 = sld [smem:[#allocation7]]  ;;  %v231_v0 = vld [vmem:[%s199_s26] sm:$0x3]  ;;  %v437_v1 = vld [vmem:[%s199_s26 + $0x2] sm:$0x3]  ;;  %s459_s20 = smul.u32 6, %s830_s4 }
  0x46   : > { %s440_s29 = sld [smem:[#allocation7 + $0x1]]  ;;  %v438_v2 = vld [vmem:[%s199_s26 + $0x4] sm:$0x3]  ;;  %v439_v4 = vld [vmem:[%s199_s26 + $0x6] sm:$0x3]  ;;  %p921_p7 = scmp.ne.s32.totalorder %s915_s23, 0 }
  0x47   : > { %s441_s27 = sld [smem:[#allocation7 + $0x2]]  ;;  %s230_s26 = scalar_lea.vmem [#allocation9], %s459_s20 }
  0x48   : > { %s442_s6 = sld [smem:[#allocation7 + $0x3]] }
  0x49   : > { %s846_s22 = sld [smem:[#allocation8]] }
  0x4a   : > { %s443_s7 = sld [smem:[#allocation7 + $0x80]] }
  0x4b   : > { %v239_v3 = vstv %s238_s25  ;;  %s444_s8 = sld [smem:[#allocation7 + $0x81]]  ;;  %s315_s25 = sshll.u32 %s230_s26, 4  ;;  %s854_s25 = int_to_ptr.vmem [resolvable:$true] %s315_s25 }
  0x4c   : > { %v240_v5 = vmul.f32 %v239_v3, %v231_v0  ;;  %v242_v6 = vstv %s440_s29  ;;  %s445_s9 = sld [smem:[#allocation7 + $0x82]]  ;;  %s460_s29 = smul.u32 96, %s682_s15 }
  0x4d   : > { %v243_v7 = vmul.f32 %v437_v1, %v242_v6  ;;  %v246_v8 = vstv %s441_s27  ;;  %s446_s21 = sld [smem:[#allocation7 + $0x83]]  ;;  %s697_s15 = smov [#allocation9]  }
  0x4e   : > { %v247_v9 = vmul.f32 %v438_v2, %v246_v8  ;;  %v250_v10 = vstv %s442_s6  ;;  %s848_s28 = sld [smem:[#allocation8 + $0x1]] }
  0x4f   : > { %v244_v11 = vadd.f32 %v243_v7, %v240_v5  ;;  %v251_v12 = vmul.f32 %v439_v4, %v250_v10  ;;  %s449_s10 = sld [smem:[#allocation7 + $0x100]]  ;;  %v254_v17 = vstv %s846_s22  ;;  %s859_s22 = scalar_lea.hbm %s910_s3, %s460_s29 }
  0x50   : > { %v259_v13 = vstv %s443_s7  ;;  %s450_s19 = sld [smem:[#allocation7 + $0x101]]  ;;  %s301_s7 = scalar_lea.sflag [#allocation4], %s830_s4 }
  0x51   : > { %v248_v14 = vadd.f32 %v247_v9, %v244_v11  ;;  %v260_v15 = vmul.f32 %v259_v13, %v231_v0  ;;  %v262_v16 = vstv %s444_s8  ;;  %s451_s11 = sld [smem:[#allocation7 + $0x102]]  ;;  %s602_s8 = scalar_lea.vmem %s854_s25, 96 }
  0x52   : > { %v263_v18 = vmul.f32 %v437_v1, %v262_v16  ;;  %v266_v19 = vstv %s445_s9  ;;  %s452_s18 = sld [smem:[#allocation7 + $0x103]]  ;;  %p603_p3 = scmp.ne.s32.totalorder %s854_s25, %s602_s8 }
  0x53   : > { %v252_v20 = vadd.f32 %v251_v12, %v248_v14  ;;  %v267_v21 = vmul.f32 %v438_v2, %v266_v19  ;;  %v270_v22 = vstv %s446_s21  ;;  %s453_s1 = sld [smem:[#allocation8 + $0x2]]  ;;  %s606_s9 = sshll.u32 %s697_s15, 4  ;;  %s607_s9 = int_to_ptr.vmem [resolvable:$false] %s606_s9 }
  0x54   : > { %v264_v23 = vadd.f32 %v263_v18, %v260_v15  ;;  %v271_v24 = vmul.f32 %v439_v4, %v270_v22  ;;  %v274_v31 = vstv %s848_s28  ;;  %p604_p13 = pnand %p603_p3, %p921_p7  ;;  %s608_s21 = scalar_lea.vmem %s607_s9, 192 }
  0x55   : > { %v255_v25 = vadd.f32 %v254_v17, %v252_v20  ;;  %v280_v26 = vstv %s449_s10  ;;  %p609_p0 = scmp.lt.s32.totalorder %s854_s25, %s607_s9  ;;  %p610_p9 = scmp.lt.s32.totalorder %s608_s21, %s602_s8 }
  0x56   : > { %v268_v27 = vadd.f32 %v267_v21, %v264_v23  ;;  %v281_v28 = vmul.f32 %v280_v26, %v231_v0  ;;  %v283_v29 = vstv %s450_s19  ;;  %p605_p4 = pneg %p604_p13 }
  0x57   : > { %v256_v30 = vmax.f32 %v255_v25, 0.0  ;;  %v284_v32 = vmul.f32 %v437_v1, %v283_v29  ;;  %v287_v33 = vstv %s451_s11  ;;  %p611_p12 = por %p610_p9, %p609_p0 }
  0x58   : > { %v272_v34 = vadd.f32 %v271_v24, %v268_v27  ;;  %v288_v35 = vmul.f32 %v438_v2, %v287_v33  ;;  %v291_v36 = vstv %s452_s18 }
  0x59   : > { %257 = vst [vmem:[%s230_s26] sm:$0x3] %v256_v30  ;;  %v285_v37 = vadd.f32 %v284_v32, %v281_v28  ;;  %v292_v38 = vmul.f32 %v439_v4, %v291_v36  ;;  %v295_v42 = vstv %s453_s1  ;;  %p612_p2 = pnand %p611_p12, %p605_p4 }
  0x5a   : > { %v275_v39 = vadd.f32 %v274_v31, %v272_v34 }
  0x5b   : > { %v289_v40 = vadd.f32 %v288_v35, %v285_v37 }
  0x5c   : > { %v276_v41 = vmax.f32 %v275_v39, 0.0 }
  0x5d   : > { %v293_v43 = vadd.f32 %v292_v38, %v289_v40 }
  0x5e   : > { %448 = vst [vmem:[%s230_s26 + $0x2] sm:$0x3] %v276_v41 }
  0x5f   : > { %v296_v44 = vadd.f32 %v295_v42, %v293_v43 }
  0x61   : > { %v297_v45 = vmax.f32 %v296_v44, 0.0 }
  0x63   : > { %454 = vst [vmem:[%s230_s26 + $0x4] sm:$0x3] %v297_v45 }
  0x64   : > { %615 = shalt.err (!%p612_p2)
}
  0x65   : > { %s616_s28 = scalar_lea.hbm %s859_s22, 96  ;;  %s620_s11 = scalar_lea.hbm %s910_s3, 192 }
  0x66   : > { %p617_p8 = scmp.ne.s32.totalorder %s859_s22, %s616_s28  ;;  %p621_p10 = scmp.lt.s32.totalorder %s859_s22, %s910_s3 }
  0x67   : > { %p622_p11 = scmp.lt.s32.totalorder %s620_s11, %s616_s28 }
  0x68   : > { %p618_p5 = pnand %p617_p8, %p921_p7 }
  0x69   : > { %p623_p1 = por %p622_p11, %p621_p10 }
  0x6a   : > { %p619_p6 = pneg %p618_p5 }
  0x6c   : > { %p624_p3 = pnand %p623_p1, %p619_p6 }
  0x6e   : > { %627 = shalt.err (!%p624_p3)
}
  0x6f   : > { %s698_s1 = smov 32   ;;  %s699_s26 = smov 2  }
  0x70   : > { %471 = dma.vmem_to_hbm [thread:$0]  (%p921_p7), %s854_s25, 96, %s859_s22, %s301_s7, %s698_s1, %s698_s1, %s699_s26  }
  0x71 PF: > { %s330_s29 = sand.u32 1, %s670_s12   ;;  %p922_p13 = scmp.ne.s32.totalorder %s916_s24, 0 }
  0x72   : > { %p923_p4 = scmp.ge.s32.totalorder %s690_s17, 2  ;;  %s331_s27 = scalar_lea.sflag [#allocation4], %s330_s29 }
  0x74   : > { %p485_p0 = pnand %p923_p4, %p922_p13 }
  0x76   : > { %p486_p9 = pneg %p485_p0 }
  0x78   : > { %665 = dma.done.wait (%p486_p9), %s331_s27, 96  }
  0x79   : > { %667 = vsyncadd (%p486_p9), %s331_s27, 4294967200  ;;  %s21_s17 = sadd.s32 1, %s690_s17   ;;  %s924_s12 = smov %s674_s13 }
  0x7a   : > { %p18_p12 = scmp.ge.s32.totalorder %s21_s17, 4   ;;  %s925_s13 = smov %s678_s14 }
  0x7b   : > { %s926_s14 = smov %s821_s30  ;;  %s927_s15 = smov %s686_s16 }
  0x7c   : > { %s928_s16 = smov %s930_s5  ;;  %20 = sbr.rel (!%p18_p12) target bundleno = 10 (0xa), region = 92 }
  0x81   :  { %336 = vsyncpa [#allocation3], 1 }
  0x82   :  { %338 = vsyncpa [#allocation3 + $0x1], 1 }
  0x83   :  { %339 = vsyncpa [#allocation4], 1 }
  0x84   :  { %341 = vsyncpa [#allocation4 + $0x1], 1 }
  0x85   :  { %342 = vsyncpa [#allocation5], 1 }
  0x86   :  { %344 = vsyncpa [#allocation5 + $0x1], 1 }
  0x87   :  { %345 = vsyncpa [#allocation6], 1 }
  0x88   :  { %347 = vsyncpa [#allocation6 + $0x1], 1 }

</bundles_post_ra>
